<compile_context>
chip_gen: v7x
topology: tpu7x:2x2x1
jax: 0.10.0
libtpu: 0.0.40
codegen_flags: <defaults>
</compile_context>

<pallas_src>
import math

import jax
import jax.numpy as jnp
from jax.experimental import pallas as pl
from jax.experimental.pallas import tpu as pltpu


def _patch_embed_kernel(x_ref, w_ref, b_ref, o_ref):
    # (tile, K_pad) @ (K_pad, n_blk*D) on the MXU, f32 accumulation, fused bias add.
    acc = jnp.dot(x_ref[0], w_ref[...], preferred_element_type=jnp.float32)
    o_ref[...] = (acc + b_ref[...]).astype(o_ref.dtype)


def _round_up(v, m):
    return ((v + m - 1) // m) * m


def _cdiv(a, b):
    return (a + b - 1) // b


def _vmem_capacity_bytes():
    try:
        info = pltpu.get_tpu_info()
        cap = int(getattr(info, "vmem_capacity_bytes", 0))
        if cap > 0:
            return cap
    except Exception:
        pass
    return 64 * 1024 * 1024          # conservative fallback (v7x per-core VMEM)


def _device_kind():
    try:
        return jax.devices()[0].device_kind.lower()
    except Exception:
        return ""


def _build_band_weight(weight, n_blk, k_band, k_pad, patch_size, stride_size):
    """Scatter the Conv1d weight (D, 1, P) into the banded GEMM weight (K_pad, n_blk*D).

    W_band[k, p*D + d] = w[d, 0, k - p*stride]  if 0 <= k - p*stride < patch else 0.
    The pattern is shift-invariant, so one copy serves every column block.
    """
    d_model = weight.shape[0]
    w2d = weight.reshape(d_model, patch_size).T.astype(jnp.float32)     # (P, D)
    k_idx = jnp.arange(k_pad)[:, None]                                  # (K_pad, 1)
    p_idx = jnp.arange(n_blk)[None, :]                                  # (1, n_blk)
    off = k_idx - p_idx * stride_size                                   # (K_pad, n_blk)
    valid = (off >= 0) & (off < patch_size) & (k_idx < k_band)
    off_safe = jnp.clip(off, 0, patch_size - 1)
    w_band = jnp.where(valid[:, :, None], w2d[off_safe], 0.0)           # (K_pad, n_blk, D)
    return w_band.reshape(k_pad, n_blk * d_model)


def num_embedding_forward(x, weight, bias, patch_size, stride_size, *,
                          input_dtype=None, output_dtype=None):
    """x: (B, T, M), weight: (d_model, 1, patch_size), bias: (d_model,).

    input_dtype:  optional streaming dtype for x / W_band (e.g. jnp.bfloat16; worthwhile
                  on every generation, v5e most of all); accumulation stays f32.
    output_dtype: optional output dtype (e.g. jnp.bfloat16 to halve the dominant HBM
                  write stream); default float32 for PyTorch parity.
    """
    B, T, M = x.shape
    d_model = weight.shape[0]
    N = (T - patch_size) // stride_size + 1
    BM = B * M

    in_dtype = jnp.dtype(input_dtype) if input_dtype is not None else jnp.dtype(x.dtype)
    out_dtype = jnp.dtype(output_dtype) if output_dtype is not None else jnp.dtype(jnp.float32)
    in_item, out_item = in_dtype.itemsize, out_dtype.itemsize
    mult = 16 if min(in_item, out_item) <= 2 else 8          # sublane multiple

    # ---- hardware-derived knobs --------------------------------------------------
    vmem_cap = _vmem_capacity_bytes()
    kind = _device_kind()
    two_cores = "v7" in kind                                  # v7x: 2 TensorCores/chip
    k_target = 128 if "v5" in kind else 256                   # band contraction target

    # ---- column blocking: n_blk conv positions per output block -------------------
    q = 128 // math.gcd(d_model, 128)          # n_blk multiple of q => (n_blk*D) % 128 == 0
    n_from_k = max(1, (k_target - patch_size) // stride_size + 1)
    n_blk = max(q, (n_from_k // q) * q)
    n_blk = min(n_blk, max(q, ((8192 // max(d_model, 1)) // q) * q))   # cap out-block width
    n_blk = min(n_blk, _round_up(N, q))
    n_blk = max(q, n_blk)
    n_pad = _round_up(N, n_blk)
    n_blocks = n_pad // n_blk
    ndb = n_blk * d_model                                     # per-block output width (%128==0)
    k_band = (n_blk - 1) * stride_size + patch_size
    k_pad = _round_up(k_band, 128)                            # lane-dense band (zero-padded)
    x_step = n_blk * stride_size

    # ---- row tile from the chip's VMEM budget -------------------------------------
    budget = max(min(int(vmem_cap * 0.70), vmem_cap - 24 * 1024 * 1024),
                 16 * 1024 * 1024)
    # TODO(synk): single-buffer the constant weight/bias blocks (pipeline_mode=pl.Buffered(1))
    # to reclaim a little more VMEM on v7x; kept default-buffered here for compile safety.
    resident = 2 * (k_pad * ndb * in_item + ndb * 4)          # weight + bias (dbl-buffered)
    per_row = 2 * (k_pad * in_item + ndb * out_item)          # x band in + out, dbl-buffered
    tile = (budget - resident) // per_row
    tile = max(mult, min(int(tile), 1024))
    tile = min(tile, _round_up(BM, mult))
    tile = max(mult, (tile // mult) * mult)
    row_tiles = _cdiv(BM, tile)
    tile = max(mult, _round_up(_cdiv(BM, row_tiles), mult))   # rebalance: avoid a huge padded tail
    row_tiles = _cdiv(BM, tile)
    if two_cores and (n_blocks % 2 == 1) and (row_tiles % 2 == 1) and BM > mult:
        row_tiles += 1                                        # even step count -> both TCs busy
        tile = max(mult, _round_up(_cdiv(BM, row_tiles), mult))
        row_tiles = _cdiv(BM, tile)
    bm_pad = row_tiles * tile

    # ---- host-side operand prep (one permute-sized pass over x; weight/bias tiny) ----
    t_need = (n_pad - 1) * stride_size + patch_size
    x_pad = x if t_need <= T else jnp.pad(x, ((0, 0), (0, t_need - T), (0, 0)))
    # (B, T, M) -> (B, M, T) -> (BM, T)   [matches x.permute(0,2,1).reshape(BM,1,T)]
    x_bm = jnp.transpose(x_pad, (0, 2, 1)).reshape(BM, -1).astype(in_dtype)
    # TODO(synk): fuse this permute + band extraction into the pallas_call (grid over
    # (B, M-tiles), contract on T straight from the (B, T, M) layout) to save one
    # XLA copy pass over x.
    x_bands = jnp.stack(
        [x_bm[:, j * x_step: j * x_step + k_band] for j in range(n_blocks)], axis=0)
    x_bands = jnp.pad(x_bands, ((0, 0), (0, bm_pad - BM), (0, k_pad - k_band)))

    w_band = _build_band_weight(weight, n_blk, k_band, k_pad,
                                patch_size, stride_size).astype(in_dtype)
    b_band = jnp.tile(bias.astype(jnp.float32), (n_blk,)).reshape(1, ndb)

    vmem_limit = int(min(vmem_cap - 16 * 1024 * 1024, budget + 24 * 1024 * 1024))
    vmem_limit = int(max(vmem_limit, budget + 8 * 1024 * 1024))

    cost = pl.CostEstimate(
        flops=2 * bm_pad * n_blocks * k_pad * ndb,
        transcendentals=0,
        bytes_accessed=(n_blocks * bm_pad * k_pad + k_pad * ndb) * in_item
        + ndb * 4 + bm_pad * n_blocks * ndb * out_item,
    )

    out = pl.pallas_call(
        _patch_embed_kernel,
        out_shape=jax.ShapeDtypeStruct((bm_pad, n_blocks * ndb), out_dtype),
        grid_spec=pltpu.PrefetchScalarGridSpec(
            num_scalar_prefetch=0,
            grid=(row_tiles, n_blocks),
            in_specs=[
                # Per-(i, j) x band, lane-dense (k_pad % 128 == 0).  If input DMA shows
                # up as exposed in a profile, pipeline_mode=pl.Buffered(3) here is the
                # knob to sweep (prefer the bf16-output path for the write side).
                pl.BlockSpec((1, tile, k_pad), lambda i, j: (j, i, 0)),
                # Banded weight / bias: constant block index -> fetched once, VMEM-resident.
                pl.BlockSpec((k_pad, ndb), lambda i, j: (0, 0)),
                pl.BlockSpec((1, ndb), lambda i, j: (0, 0)),
            ],
            out_specs=pl.BlockSpec((tile, ndb), lambda i, j: (i, j)),
        ),
        compiler_params=pltpu.CompilerParams(
            dimension_semantics=("parallel", "parallel"),
            vmem_limit_bytes=vmem_limit,
        ),
        cost_estimate=cost,
    )(x_bands, w_band, b_band)

    # (BM, N_pad*D) row-major == (b, m, n, d); drop padded rows and conv positions.
    return out[:BM].reshape(B, M, n_pad, d_model)[:, :, :N, :]


def _reference(x, weight, bias, patch_size, stride_size):
    """Plain-JAX reference of the PyTorch forward (independent of the banding trick)."""
    B, T, M = x.shape
    d_model = weight.shape[0]
    N = (T - patch_size) // stride_size + 1
    x_bm = jnp.transpose(x, (0, 2, 1)).reshape(B * M, T)
    starts = jnp.arange(N) * stride_size
    idx = starts[:, None] + jnp.arange(patch_size)[None, :]
    patches = x_bm[:, idx]                                        # (B*M, N, P)
    w2d = weight.reshape(d_model, patch_size)                     # (D, P)
    out = jnp.einsum("rnp,dp->rnd", patches, w2d) + bias[None, None, :]
    return out.reshape(B, M, N, d_model)


if __name__ == "__main__":
    # Small shapes consistent with the module's forward.
    B, T, M = 2, 16, 4
    d_model, patch_size, stride_size = 32, 4, 2

    key = jax.random.PRNGKey(0)
    kx, kw, kb = jax.random.split(key, 3)

    x = jax.random.normal(kx, (B, T, M), dtype=jnp.float32)

    # Deterministic Conv1d parameter init (PyTorch-style uniform bound 1/sqrt(fan_in)).
    fan_in = 1 * patch_size
    bound = 1.0 / (fan_in ** 0.5)
    weight = jax.random.uniform(kw, (d_model, 1, patch_size),
                                minval=-bound, maxval=bound, dtype=jnp.float32)
    bias = jax.random.uniform(kb, (d_model,),
                              minval=-bound, maxval=bound, dtype=jnp.float32)

    N = (T - patch_size) // stride_size + 1
    ref = _reference(x, weight, bias, patch_size, stride_size)

    # f32 path (PyTorch numerics parity).
    out = num_embedding_forward(x, weight, bias, patch_size, stride_size)
    out = jax.block_until_ready(out)
    assert out.shape == (B, M, N, d_model)
    assert jnp.allclose(out, ref, atol=1e-5, rtol=1e-5)

    # Opt-in bf16 streaming + bf16 output: halves the HBM read and (dominant) write
    # streams; accumulation stays f32, so only input/output rounding error remains.
    out_bf16 = num_embedding_forward(x, weight, bias, patch_size, stride_size,
                                     input_dtype=jnp.bfloat16,
                                     output_dtype=jnp.bfloat16)
    out_bf16 = jax.block_until_ready(out_bf16)
    assert out_bf16.shape == (B, M, N, d_model)
    assert jnp.allclose(out_bf16.astype(jnp.float32), ref, atol=1e-1, rtol=1e-1)

    print("KERNEL_OK")
</pallas_src>

<mosaic_0001>
module attributes {stable_mosaic.version = 11 : i64} {
  func.func @_patch_embed_kernel(%arg0: i32, %arg1: i32, %arg2: memref<1x8x128xf32, #tpu.memory_space<vmem>>, %arg3: memref<128x256xf32, #tpu.memory_space<vmem>>, %arg4: memref<1x256xf32, #tpu.memory_space<vmem>>, %arg5: memref<8x256xf32, #tpu.memory_space<vmem>>) attributes {dimension_semantics = [#tpu.dimension_semantics<parallel>, #tpu.dimension_semantics<parallel>], iteration_bounds = array<i64: 1, 1>, scalar_prefetch = 0 : i64, scratch_operands = 0 : i64, tpu.core_type = #tpu.core_type<tc>, window_params = [{transform_indices = @transform_0, window_bounds = array<i64: 1, 8, 128>}, {pipeline_mode = #tpu.pipeline_mode<synchronous>, transform_indices = @transform_1, window_bounds = array<i64: 128, 256>}, {pipeline_mode = #tpu.pipeline_mode<synchronous>, transform_indices = @transform_2, window_bounds = array<i64: 1, 256>}, {transform_indices = @transform_3, window_bounds = array<i64: 8, 256>}]} {
    %c0 = arith.constant 0 : index
    %c0_0 = arith.constant 0 : index
    %c0_1 = arith.constant 0 : index
    %0 = vector.load %arg2[%c0, %c0_0, %c0_1] : memref<1x8x128xf32, #tpu.memory_space<vmem>>, vector<1x8x128xf32>
    %1 = vector.shape_cast %0 : vector<1x8x128xf32> to vector<8x128xf32>
    %c0_2 = arith.constant 0 : index
    %c0_3 = arith.constant 0 : index
    %2 = vector.load %arg3[%c0_2, %c0_3] : memref<128x256xf32, #tpu.memory_space<vmem>>, vector<128x256xf32>
    %cst = arith.constant dense<0.000000e+00> : vector<8x256xf32>
    %3 = tpu.matmul %1, %2, %cst {dimension_numbers = #tpu.dot_dimension_numbers<[1], [0], [0], [1], [0, 0, 1, 1], [], []>} : vector<8x128xf32>, vector<128x256xf32>, vector<8x256xf32> -> vector<8x256xf32>
    %c0_4 = arith.constant 0 : index
    %c0_5 = arith.constant 0 : index
    %4 = vector.load %arg4[%c0_4, %c0_5] : memref<1x256xf32, #tpu.memory_space<vmem>>, vector<1x256xf32>
    %5 = vector.broadcast %4 : vector<1x256xf32> to vector<8x256xf32>
    %6 = arith.addf %3, %5 : vector<8x256xf32>
    %c0_6 = arith.constant 0 : index
    %c0_7 = arith.constant 0 : index
    %7 = vector.load %arg5[%c0_6, %c0_7] : memref<8x256xf32, #tpu.memory_space<vmem>>, vector<8x256xf32>
    tpu.vector_store %arg5[%c0_6, %c0_7], %6 {strides = array<i32>} : memref<8x256xf32, #tpu.memory_space<vmem>>, vector<8x256xf32>,
    return
  }
  func.func @transform_0(%arg0: i32, %arg1: i32) -> (i32, i32, i32) {
    %c0_i32 = arith.constant 0 : i32
    %c0_i32_0 = arith.constant 0 : i32
    return %arg1, %arg0, %c0_i32 : i32, i32, i32
  }
  func.func @transform_1(%arg0: i32, %arg1: i32) -> (i32, i32) {
    %c0_i32 = arith.constant 0 : i32
    %c0_i32_0 = arith.constant 0 : i32
    %c0_i32_1 = arith.constant 0 : i32
    return %c0_i32, %c0_i32_0 : i32, i32
  }
  func.func @transform_2(%arg0: i32, %arg1: i32) -> (i32, i32) {
    %c0_i32 = arith.constant 0 : i32
    %c0_i32_0 = arith.constant 0 : i32
    %c0_i32_1 = arith.constant 0 : i32
    return %c0_i32, %c0_i32_0 : i32, i32
  }
  func.func @transform_3(%arg0: i32, %arg1: i32) -> (i32, i32) {
    %c0_i32 = arith.constant 0 : i32
    return %arg0, %arg1 : i32, i32
  }
}

</mosaic_0001>

<bundles_post_ra>
// kernel: tpu_custom_call.1
= control target key start
LH: loop header
LB: loop body
LE: loop exit
PB: predicated region body
PF: predicated region fallthrough
CT: control target
= control target key end

     0   :  { %8 = vsyncpa [#allocation3], 0  ;;  %s357_s0 = inlined_call_operand.hbm [shape: f32[1,8,128], index: 0, kind: input, shape index: {}]   ;;  %s358_s1 = inlined_call_operand.hbm [shape: f32[128,256], index: 1, kind: input, shape index: {}]   ;;  %s359_s2 = inlined_call_operand.vmem [shape: f32[1,256], index: 2, kind: input, shape index: {}]   ;;  %s360_s3 = inlined_call_operand.hbm [shape: f32[8,256], index: 3, kind: output, shape index: {}]  }
   0x1   :  { %9 = vsyncpa [#allocation6], 0 }
   0x2   :  { %10 = vsyncpa [#allocation4], 0  ;;  %s285_s12 = smov [#allocation2]   ;;  %s286_s14 = smov [#allocation5]  }
   0x3   :  { %s17_s13 = sshll.u32 %s285_s12, 4  ;;  %s26_s15 = sshll.u32 %s286_s14, 4  ;;  %s18_s13 = int_to_ptr.vmem [resolvable:$true] %s17_s13  ;;  %s311_s15 = int_to_ptr.vmem [resolvable:$true] %s26_s15 }
   0x4   :  { %s213_s18 = scalar_lea.hbm %s357_s0, 128 }
   0x5   :  { %p214_p0 = scmp.ne.s32.totalorder %s357_s0, %s213_s18  ;;  %p217_p1 = scmp.lt.u32.totalorder %s213_s18, %s357_s0 }
   0x7   :  { %p219_p2 = pnand %p217_p1, %p214_p0 }
   0x9   :  { %222 = shalt.err (!%p219_p2)
}
   0xa   :  { %s223_s23 = scalar_lea.vmem %s18_s13, 128  ;;  %p228_p4 = scmp.lt.s32.totalorder %s18_s13, %s18_s13 }
   0xb   :  { %p224_p3 = scmp.ne.s32.totalorder %s18_s13, %s223_s23  ;;  %p229_p5 = scmp.lt.s32.totalorder %s223_s23, %s223_s23 }
   0xd   :  { %p230_p6 = por %p229_p5, %p228_p4 }
   0xf   :  { %p231_p7 = pnand %p230_p6, %p224_p3 }
  0x11   :  { %234 = shalt.err (!%p231_p7)
}
  0x12   :  { %20 = dma.hbm_to_vmem [thread:$0]  %s357_s0, 128, %s18_s13, [#allocation3]  }
  0x13   :  { %s235_s28 = scalar_lea.hbm %s358_s1, 4096 }
  0x14   :  { %p236_p8 = scmp.ne.s32.totalorder %s358_s1, %s235_s28  ;;  %p239_p9 = scmp.lt.u32.totalorder %s235_s28, %s358_s1 }
  0x16   :  { %p241_p10 = pnand %p239_p9, %p236_p8 }
  0x18   :  { %244 = shalt.err (!%p241_p10)
}
  0x19   :  { %s245_s6 = scalar_lea.vmem %s311_s15, 4096  ;;  %p250_p12 = scmp.lt.s32.totalorder %s311_s15, %s311_s15 }
  0x1a   :  { %p246_p11 = scmp.ne.s32.totalorder %s311_s15, %s245_s6  ;;  %p251_p13 = scmp.lt.s32.totalorder %s245_s6, %s245_s6 }
  0x1c   :  { %p252_p0 = por %p251_p13, %p250_p12 }
  0x1e   :  { %p253_p1 = pnand %p252_p0, %p246_p11 }
  0x20   :  { %256 = shalt.err (!%p253_p1)
}
  0x21   :  { %s287_s0 = smov 256   ;;  %s288_s7 = smov 16  }
  0x22   :  { %32 = dma.hbm_to_vmem [thread:$0]  %s358_s1, 4096, %s311_s15, [#allocation6], %s287_s0, %s287_s0, %s288_s7  }
  0x23   :  { %279 = dma.done.wait [#allocation3], 128  }
  0x24   :  { %280 = vsyncadd [#allocation3], 4294967168 }
  0x25   :  { %281 = dma.done.wait [#allocation6], 4096  }
  0x26   :  { %282 = vsyncadd [#allocation6], 4294963200  ;;  %v289_v0 = vmov 0.0   ;;  %v43_v1 = vld [vmem:[#allocation5 + $0x8] sm:$0xff]  ;;  %v45_v2 = vld [vmem:[#allocation5 + $0x18] sm:$0xff]  ;;  %v76_v50 = vlaneseq  ;;  %s290_s11 = smov [#allocation7]  }
  0x27   :  { %150 = vmatprep.mubr.f32.mxu0 %v289_v0  ;;  %v42_v3 = vld [vmem:[#allocation5] sm:$0xff]  ;;  %v175_v4 = vpack.c.bf16 %v45_v2, %v43_v1  ;;  %v44_v5 = vld [vmem:[#allocation5 + $0x10] sm:$0xff]  ;;  %v47_v6 = vld [vmem:[#allocation5 + $0x28] sm:$0xff]  ;;  %s165_s12 = sshll.u32 %s290_s11, 4  ;;  %s166_s12 = int_to_ptr.vmem [resolvable:$true] %s165_s12 }
  0x28   :  { %v49_v7 = vld [vmem:[#allocation5 + $0x38] sm:$0xff]  ;;  %v177_v8 = vpack.c.bf16 %v44_v5, %v42_v3  ;;  %v46_v10 = vld [vmem:[#allocation5 + $0x20] sm:$0xff]  ;;  %v48_v11 = vld [vmem:[#allocation5 + $0x30] sm:$0xff]  ;;  %v77_v51 = vshrl.u32 %v76_v50, 7  ;;  %s257_s13 = scalar_lea.vmem %s166_s12, 256  ;;  %p262_p3 = scmp.lt.s32.totalorder %s166_s12, %s166_s12 }
  0x29   :  { %v179_v9 = vpack.c.bf16 %v49_v7, %v47_v6  ;;  %v51_v12 = vld [vmem:[#allocation5 + $0x48] sm:$0xff]  ;;  %176 = vmatprep.subr.bf16.mxu0 %v175_v4  ;;  %v53_v13 = vld [vmem:[#allocation5 + $0x58] sm:$0xff]  ;;  %v181_v14 = vpack.c.bf16 %v48_v11, %v46_v10  ;;  %v50_v16 = vld [vmem:[#allocation5 + $0x40] sm:$0xff]  ;;  %p258_p2 = scmp.ne.s32.totalorder %s166_s12, %s257_s13  ;;  %p263_p4 = scmp.lt.s32.totalorder %s257_s13, %s257_s13 }
  0x2a   :  { %178 = vmatpush1.bf16.msra.mxu0 %v177_v8  ;;  %v183_v15 = vpack.c.bf16 %v53_v13, %v51_v12  ;;  %v52_v17 = vld [vmem:[#allocation5 + $0x50] sm:$0xff]  ;;  %v55_v18 = vld [vmem:[#allocation5 + $0x68] sm:$0xff]  ;;  %v57_v19 = vld [vmem:[#allocation5 + $0x78] sm:$0xff]  ;;  %v78_v52 = vsub.s32 0, %v77_v51  ;;  %v82_v54 = vsub.s32 1, %v77_v51 }
  0x2b   :  { %180 = vmatprep.subr.bf16.mxu0 %v179_v9  ;;  %v185_v20 = vpack.c.bf16 %v52_v17, %v50_v16  ;;  %v187_v21 = vpack.c.bf16 %v57_v19, %v55_v18  ;;  %v54_v22 = vld [vmem:[#allocation5 + $0x60] sm:$0xff]  ;;  %v56_v23 = vld [vmem:[#allocation5 + $0x70] sm:$0xff]  ;;  %v59_v24 = vld [vmem:[#allocation5 + $0x88] sm:$0xff]  ;;  %p264_p5 = por %p263_p4, %p262_p3 }
  0x2c   :  { %v61_v25 = vld [vmem:[#allocation5 + $0x98] sm:$0xff]  ;;  %v189_v26 = vpack.c.bf16 %v56_v23, %v54_v22  ;;  %v58_v28 = vld [vmem:[#allocation5 + $0x80] sm:$0xff]  ;;  %v60_v29 = vld [vmem:[#allocation5 + $0x90] sm:$0xff] }
  0x2d   :  { %v191_v27 = vpack.c.bf16 %v61_v25, %v59_v24  ;;  %v63_v30 = vld [vmem:[#allocation5 + $0xa8] sm:$0xff]  ;;  %v65_v31 = vld [vmem:[#allocation5 + $0xb8] sm:$0xff]  ;;  %v193_v32 = vpack.c.bf16 %v60_v29, %v58_v28  ;;  %v62_v34 = vld [vmem:[#allocation5 + $0xa0] sm:$0xff]  ;;  %p265_p6 = pnand %p264_p5, %p258_p2 }
  0x2e   :  { %182 = vmatpush1.bf16.msra.mxu0 %v181_v14  ;;  %v195_v33 = vpack.c.bf16 %v65_v31, %v63_v30  ;;  %v64_v35 = vld [vmem:[#allocation5 + $0xb0] sm:$0xff]  ;;  %v67_v36 = vld [vmem:[#allocation5 + $0xc8] sm:$0xff]  ;;  %v69_v37 = vld [vmem:[#allocation5 + $0xd8] sm:$0xff] }
  0x2f   :  { %184 = vmatprep.subr.bf16.mxu0 %v183_v15  ;;  %v197_v38 = vpack.c.bf16 %v64_v35, %v62_v34  ;;  %v199_v39 = vpack.c.bf16 %v69_v37, %v67_v36  ;;  %v66_v40 = vld [vmem:[#allocation5 + $0xc0] sm:$0xff]  ;;  %v68_v41 = vld [vmem:[#allocation5 + $0xd0] sm:$0xff]  ;;  %v71_v42 = vld [vmem:[#allocation5 + $0xe8] sm:$0xff] }
  0x30   :  { %v73_v43 = vld [vmem:[#allocation5 + $0xf8] sm:$0xff]  ;;  %v201_v44 = vpack.c.bf16 %v68_v41, %v66_v40  ;;  %v70_v46 = vld [vmem:[#allocation5 + $0xe0] sm:$0xff]  ;;  %v72_v47 = vld [vmem:[#allocation5 + $0xf0] sm:$0xff] }
  0x31   :  { %v203_v45 = vpack.c.bf16 %v73_v43, %v71_v42  ;;  %v205_v48 = vpack.c.bf16 %v72_v47, %v70_v46  ;;  %v41_v49 = vld [vmem:[#allocation2] sm:$0xff] }
  0x32   :  { %186 = vmatpush1.bf16.msra.mxu0 %v185_v20  ;;  %v74_v53 = vld [vmem:[%s359_s2] sm:$0x3] }
  0x33   :  { %188 = vmatprep.subr.bf16.mxu0 %v187_v21  ;;  %v79_v55 = vrot.slane %v74_v53, %v78_v52  ;;  %v83_v56 = vrot.slane %v74_v53, %v82_v54 }
  0x36   :  { %190 = vmatpush1.bf16.msra.mxu0 %v189_v26 }
  0x37   :  { %192 = vmatprep.subr.bf16.mxu0 %v191_v27 }
  0x3a   :  { %194 = vmatpush1.bf16.msra.mxu0 %v193_v32 }
  0x3b   :  { %196 = vmatprep.subr.bf16.mxu0 %v195_v33 }
  0x3e   :  { %198 = vmatpush1.bf16.msra.mxu0 %v197_v38 }
  0x3f   :  { %200 = vmatprep.subr.bf16.mxu0 %v199_v39 }
  0x42   :  { %202 = vmatpush1.bf16.msra.mxu0 %v201_v44 }
  0x43   :  { %204 = vmatprep.subr.bf16.mxu0 %v203_v45 }
  0x46   :  { %206 = vmatpush1.bf16.msra.mxu0 %v205_v48 }
  0x49   :  { %151 = vmatmul.mubr.f32.vlgmr.msra.gmra.mrb[0].mxu0 %v41_v49 }
 0x11c   :  { %v152_v57 = vpop.f32.mrb[0].mxu0 }
 0x11d   :  { %v153_v58 = vadd.f32 %v152_v57, %v79_v55  ;;  %v154_v59 = vpop.f32.mrb[1].mxu0 }
 0x11e   :  { %v155_v60 = vadd.f32 %v154_v59, %v83_v56 }
 0x11f   :  { %157 = vst [vmem:[#allocation7] sm:$0xff] %v153_v58 }
 0x120   :  { %158 = vst [vmem:[#allocation7 + $0x8] sm:$0xff] %v155_v60 }
 0x121   :  { %268 = shalt.err (!%p265_p6)
}
 0x122   :  { %s269_s15 = scalar_lea.hbm %s360_s3, 256 }
 0x123   :  { %p270_p7 = scmp.ne.s32.totalorder %s360_s3, %s269_s15  ;;  %p273_p8 = scmp.lt.u32.totalorder %s269_s15, %s360_s3 }
 0x125   :  { %p275_p9 = pnand %p273_p8, %p270_p7 }
 0x127   :  { %278 = shalt.err (!%p275_p9)
}
 0x128   :  { %168 = dma.vmem_to_hbm [thread:$0]  %s166_s12, 256, %s360_s3, [#allocation4]  }
 0x129   :  { %283 = dma.done.wait [#allocation4], 256  }
 0x12a   :  { %284 = vsyncadd [#allocation4], 4294967040 }
 0x12b   :  { %172 = vsyncpa [#allocation3], 1 }
 0x12c   :  { %173 = vsyncpa [#allocation6], 1 }
 0x12d   :  { %174 = vsyncpa [#allocation4], 1 }

</bundles_post_ra>
